<compile_context>
chip_gen: v6e
topology: v6e:2x2x1
jax: 0.10.0
libtpu: 0.0.40
codegen_flags: <defaults>
</compile_context>

<pallas_src>
import functools

import jax
import jax.numpy as jnp
from jax import lax
from jax.experimental import pallas as pl
from jax.experimental.pallas import tpu as pltpu

_NEG = -1e30          # large-negative mask value (avoids inf-inf NaN corners)
_OUT_LANES = 128      # lane-dense width for the (T, topk) routing outputs


def _round_up(a: int, m: int) -> int:
    return (a + m - 1) // m * m


def _is_v7() -> bool:
    try:
        return "7" in jax.devices()[0].device_kind.lower()
    except Exception:
        return False


def _vmem_capacity_bytes() -> int:
    try:
        info = pltpu.get_tpu_info()
        cap = getattr(info, "vmem_capacity_bytes", None)
        if cap:
            return int(cap)
    except Exception:
        pass
    # Conservative fallback: 64 MiB on v7x-class parts, 128 MiB otherwise.
    return (64 << 20) if _is_v7() else (128 << 20)


def _pick_tm(T: int, D_pad: int, E_pad: int, itemsize: int, budget: int) -> int:
    """Largest token tile whose estimated VMEM footprint fits the budget."""
    resident = 2 * D_pad * E_pad * itemsize + 2 * 8 * E_pad * 4   # W + bias tiles
    tm = 128
    for cand in (1024, 512, 256, 128):
        per_tile = (2 * cand * D_pad * itemsize                   # x (double-buffered)
                    + 2 * cand * _OUT_LANES * (itemsize + 4)      # routing outputs
                    + 2 * 8 * 2 * E_pad * 4                       # stats partials
                    + 10 * cand * E_pad * 4)                      # f32 epilogue temps
        if resident + per_tile <= budget:
            tm = cand
            break
    return min(tm, _round_up(max(T, 8), 8))


def _gate_kernel(x_ref, w_ref, b_ref,
                 weights_ref, indices_ref, stats_ref,
                 *, topk: int, t_real: int, e_real: int, tm: int):
    # ---- scores = x @ W^T on the MXU (bf16 operands, fp32 accumulate) ----
    scores = jnp.dot(x_ref[...], w_ref[...],
                     preferred_element_type=jnp.float32)          # (TM, E_pad) f32
    TM, E_pad = scores.shape

    e_iota = lax.broadcasted_iota(jnp.int32, (TM, E_pad), 1)
    if e_real != E_pad:                                           # static guard
        e_valid = e_iota < e_real
        scores = jnp.where(e_valid, scores, _NEG)

    # ---- softmax over experts (fp32), EUP reciprocal for the denominator ----
    m = jnp.max(scores, axis=-1, keepdims=True)
    e = jnp.exp(scores - m)
    denom = jnp.sum(e, axis=-1, keepdims=True)
    orig = e * pl.reciprocal(denom, approx=True)                  # (TM, E_pad) f32

    b = b_ref[...]                                                # (1, E_pad) f32
    if e_real != E_pad:
        biased = jnp.where(e_valid, orig + b, _NEG)               # padded never picked
    else:
        biased = orig + b

    # ---- iterative top-k (k small & static; ties -> lowest index) ----
    # Loop invariants hoisted; gathered prob recovered EXACTLY from the one-hot.
    e_iota_f = e_iota.astype(jnp.float32)
    k_iota = lax.broadcasted_iota(jnp.int32, (TM, _OUT_LANES), 1)
    out_w = jnp.zeros((TM, _OUT_LANES), jnp.float32)
    out_i = jnp.zeros((TM, _OUT_LANES), jnp.int32)
    selected = jnp.zeros((TM, E_pad), jnp.float32)

    for k in range(topk):
        mval = jnp.max(biased, axis=-1, keepdims=True)            # (TM, 1)
        is_max = biased == mval
        idx_f = jnp.min(jnp.where(is_max, e_iota_f, float(E_pad)),
                        axis=-1, keepdims=True)                   # lowest tied index
        idx = idx_f.astype(jnp.int32)                             # (TM, 1)
        sel = e_iota == idx                                       # exact one-hot
        wk = jnp.sum(jnp.where(sel, orig, 0.0),
                     axis=-1, keepdims=True)                      # exact gather
        out_w = jnp.where(k_iota == k, wk, out_w)
        out_i = jnp.where(k_iota == k, idx, out_i)
        selected = selected + sel.astype(jnp.float32)
        biased = jnp.where(sel, _NEG, biased)                     # drop from next round

    # ---- single lane-dense post-loop stores for routing outputs ----
    weights_ref[...] = out_w.astype(weights_ref.dtype)
    indices_ref[...] = out_i

    # ---- per-tile partial stats; ragged-row mask only when needed (static) ----
    if t_real % tm != 0:
        row0 = pl.program_id(0) * tm
        r_iota = lax.broadcasted_iota(jnp.int32, (TM, 1), 0)
        row_valid = ((row0 + r_iota) < t_real).astype(jnp.float32)
        selected = selected * row_valid
        orig = orig * row_valid

    # Only sublane 0 of the (8, 2*E_pad) partial block carries data; the
    # wrapper reads rows [::8].  counts in lanes [0, E_pad), prob-sums after.
    stats_ref[0:1, 0:E_pad] = jnp.sum(selected, axis=0, keepdims=True)
    stats_ref[0:1, E_pad:2 * E_pad] = jnp.sum(orig, axis=0, keepdims=True)


def prepare_gate_params(weight, bias, compute_dtype=jnp.bfloat16):
    """weight: (E, D) [nn.Linear layout], bias: (E,). Done once, off the hot path."""
    E, D = weight.shape
    E_pad = _round_up(E, 128)
    D_pad = _round_up(D, 128)
    w_t = weight.T.astype(compute_dtype)                          # (D, E)
    if (D, E) != (D_pad, E_pad):
        w_t = jnp.zeros((D_pad, E_pad), compute_dtype).at[:D, :E].set(w_t)
    b2d = jnp.zeros((1, E_pad), jnp.float32).at[0, :E].set(bias.astype(jnp.float32))
    return w_t, b2d


def gate_forward(x, w_t, b2d, *, topk: int, n_experts: int):
    """x: (T, D); w_t: (D_pad, E_pad) pre-transposed bf16; b2d: (1, E_pad) f32."""
    T, D = x.shape
    D_pad, E_pad = w_t.shape
    E = n_experts
    assert topk <= _OUT_LANES
    out_dtype = x.dtype
    compute_dtype = w_t.dtype
    itemsize = jnp.dtype(compute_dtype).itemsize

    vmem_budget = (_vmem_capacity_bytes() * 3) // 4
    TM = _pick_tm(T, D_pad, E_pad, itemsize, vmem_budget)
    T_pad = _round_up(T, TM)
    nt = T_pad // TM

    # Pad / cast the activation only when actually required.
    if (T_pad, D_pad) == (T, D) and x.dtype == compute_dtype:
        xp = x
    else:
        xp = jnp.zeros((T_pad, D_pad), compute_dtype).at[:T, :D].set(
            x.astype(compute_dtype))

    kernel = functools.partial(_gate_kernel, topk=topk, t_real=T, e_real=E, tm=TM)

    cost = pl.CostEstimate(
        flops=int(2 * T_pad * D_pad * E_pad),
        transcendentals=int(T_pad * E_pad),
        bytes_accessed=int(T_pad * D_pad * itemsize + D_pad * E_pad * itemsize
                           + E_pad * 4
                           + T_pad * _OUT_LANES * (jnp.dtype(out_dtype).itemsize + 4)
                           + nt * 8 * 2 * E_pad * 4),
    )

    if _is_v7():
        # 64 MiB part: resident operands single-buffered; spend VMEM on TM.
        w_spec = pl.BlockSpec((D_pad, E_pad), lambda i: (0, 0),
                              pipeline_mode=pl.Buffered(1))
        b_spec = pl.BlockSpec((1, E_pad), lambda i: (0, 0),
                              pipeline_mode=pl.Buffered(1))
    else:
        w_spec = pl.BlockSpec((D_pad, E_pad), lambda i: (0, 0))
        b_spec = pl.BlockSpec((1, E_pad), lambda i: (0, 0))

    weights, indices, stats_p = pl.pallas_call(
        kernel,
        out_shape=(
            jax.ShapeDtypeStruct((T_pad, _OUT_LANES), out_dtype),    # routing weights
            jax.ShapeDtypeStruct((T_pad, _OUT_LANES), jnp.int32),    # expert indices
            jax.ShapeDtypeStruct((nt * 8, 2 * E_pad), jnp.float32),  # [counts | probs]
        ),
        grid_spec=pltpu.PrefetchScalarGridSpec(
            num_scalar_prefetch=0,
            grid=(nt,),
            in_specs=[
                pl.BlockSpec((TM, D_pad), lambda i: (i, 0)),
                w_spec,                                              # resident
                b_spec,                                              # resident
            ],
            out_specs=[
                pl.BlockSpec((TM, _OUT_LANES), lambda i: (i, 0)),
                pl.BlockSpec((TM, _OUT_LANES), lambda i: (i, 0)),
                pl.BlockSpec((8, 2 * E_pad), lambda i: (i, 0)),
            ],
        ),
        compiler_params=pltpu.CompilerParams(
            # TODO(synk): on v7x, verify the token axis shards across both TCs;
            # otherwise switch to pltpu.CORE_PARALLEL / an explicit core axis.
            dimension_semantics=("parallel",),
            vmem_limit_bytes=int(min(vmem_budget, 112 * 1024 * 1024))),
        cost_estimate=cost,
    )(xp, w_t, b2d)

    weights = weights[:T, :topk]
    indices = indices[:T, :topk]
    sums = stats_p[::8].sum(axis=0)                  # only sublane 0 per tile is valid
    counts = sums[:E]                                # float bincount
    probs = sums[E_pad:E_pad + E] / T                # mean over real tokens
    f_i = counts * E / (topk * T + 1e-6)
    stats = {"f_i": f_i, "expert_probs": probs}
    return weights, indices, stats


class Gate:
    """Thin stateful wrapper mirroring the PyTorch module (holds f_i_accum)."""

    def __init__(self, n_embd, n_routed_experts, n_activated_experts, key,
                 compute_dtype=jnp.bfloat16):
        self.dim = n_embd
        self.n_routed_experts = n_routed_experts
        self.topk = n_activated_experts
        k_w, k_b = jax.random.split(key)
        # nn.Linear(dim, E, bias=False): weight shape (E, dim)
        bound = 1.0 / (n_embd ** 0.5)
        self.weight = jax.random.uniform(
            k_w, (n_routed_experts, n_embd), jnp.float32, -bound, bound)
        # torch.empty(E) is uninitialized; initialize deterministically.
        self.bias = jax.random.normal(k_b, (n_routed_experts,), jnp.float32) * 0.01
        # Pre-transposed / padded / cast once — no per-call weight copies.
        self.w_t, self.b2d = prepare_gate_params(self.weight, self.bias, compute_dtype)
        self.f_i_accum = None

    def __call__(self, x):
        x2 = x.reshape(-1, self.dim)
        weights, indices, stats = gate_forward(
            x2, self.w_t, self.b2d, topk=self.topk, n_experts=self.n_routed_experts)
        if self.f_i_accum is None:
            self.f_i_accum = jnp.zeros_like(stats["f_i"])
        self.f_i_accum = self.f_i_accum + stats["f_i"]
        return weights, indices, stats


if __name__ == "__main__":
    key = jax.random.PRNGKey(0)
    k_x, k_p = jax.random.split(key)

    T, D, E, K = 8, 32, 8, 2          # tokens, n_embd, n_routed, n_activated
    x = jax.random.normal(k_x, (T, D), jnp.bfloat16)   # native MXU dtype

    gate = Gate(n_embd=D, n_routed_experts=E, n_activated_experts=K, key=k_p)
    weights, indices, stats = gate(x)

    jax.block_until_ready((weights, indices, stats["f_i"], stats["expert_probs"]))

    assert weights.shape == (T, K) and weights.dtype == x.dtype
    assert indices.shape == (T, K) and indices.dtype == jnp.int32
    assert stats["f_i"].shape == (E,)
    assert stats["expert_probs"].shape == (E,)
    assert bool(jnp.all((indices >= 0) & (indices < E)))
    assert bool(jnp.all(indices[:, 0] != indices[:, 1]))          # distinct experts
    assert abs(float(stats["f_i"].sum()) - E) < 1e-2              # counts sum = T*K
    assert abs(float(stats["expert_probs"].sum()) - 1.0) < 1e-2   # softmax mean sums to 1
    assert bool(jnp.all(jnp.isfinite(weights.astype(jnp.float32))))
    print("KERNEL_OK")
</pallas_src>

<mosaic_0001>
module attributes {stable_mosaic.version = 11 : i64} {
  func.func @_gate_kernel(%arg0: i32, %arg1: memref<8x128xbf16, #tpu.memory_space<vmem>>, %arg2: memref<128x128xbf16, #tpu.memory_space<vmem>>, %arg3: memref<1x128xf32, #tpu.memory_space<vmem>>, %arg4: memref<8x128xbf16, #tpu.memory_space<vmem>>, %arg5: memref<8x128xi32, #tpu.memory_space<vmem>>, %arg6: memref<8x256xf32, #tpu.memory_space<vmem>>) attributes {dimension_semantics = [#tpu.dimension_semantics<parallel>], iteration_bounds = array<i64: 1>, scalar_prefetch = 0 : i64, scratch_operands = 0 : i64, tpu.core_type = #tpu.core_type<tc>, window_params = [{transform_indices = @transform_0, window_bounds = array<i64: 8, 128>}, {pipeline_mode = #tpu.pipeline_mode<synchronous>, transform_indices = @transform_1, window_bounds = array<i64: 128, 128>}, {pipeline_mode = #tpu.pipeline_mode<synchronous>, transform_indices = @transform_2, window_bounds = array<i64: 1, 128>}, {transform_indices = @transform_3, window_bounds = array<i64: 8, 128>}, {transform_indices = @transform_4, window_bounds = array<i64: 8, 128>}, {transform_indices = @transform_5, window_bounds = array<i64: 8, 256>}]} {
    %c0 = arith.constant 0 : index
    %c0_0 = arith.constant 0 : index
    %0 = vector.load %arg1[%c0, %c0_0] : memref<8x128xbf16, #tpu.memory_space<vmem>>, vector<8x128xbf16>
    %c0_1 = arith.constant 0 : index
    %c0_2 = arith.constant 0 : index
    %1 = vector.load %arg2[%c0_1, %c0_2] : memref<128x128xbf16, #tpu.memory_space<vmem>>, vector<128x128xbf16>
    %cst = arith.constant dense<0.000000e+00> : vector<8x128xf32>
    %2 = tpu.matmul %0, %1, %cst {dimension_numbers = #tpu.dot_dimension_numbers<[1], [0], [0], [1], [0, 0, 1, 1], [], []>} : vector<8x128xbf16>, vector<128x128xbf16>, vector<8x128xf32> -> vector<8x128xf32>
    %3 = tpu.iota {dimensions = array<i32: 1>} : vector<8x128xi32>
    %c8_i32 = arith.constant 8 : i32
    %4 = vector.broadcast %c8_i32 : i32 to vector<8x128xi32>
    %5 = arith.cmpi slt, %3, %4 : vector<8x128xi32>
    %cst_3 = arith.constant -1.000000e+30 : f32
    %6 = vector.broadcast %cst_3 : f32 to vector<8x128xf32>
    %7 = arith.select %5, %2, %6 : vector<8x128xi1>, vector<8x128xf32>
    %cst_4 = arith.constant dense<0xFF800000> : vector<8xf32>
    %8 = vector.multi_reduction <maximumf>, %7, %cst_4 [1] : vector<8x128xf32> to vector<8xf32>
    %9 = vector.shape_cast %8 : vector<8xf32> to vector<8x1xf32>
    %10 = vector.broadcast %9 : vector<8x1xf32> to vector<8x128xf32>
    %11 = arith.subf %7, %10 : vector<8x128xf32>
    %12 = math.exp %11 : vector<8x128xf32>
    %cst_5 = arith.constant dense<0.000000e+00> : vector<8xf32>
    %13 = vector.multi_reduction <add>, %12, %cst_5 [1] : vector<8x128xf32> to vector<8xf32>
    %14 = vector.shape_cast %13 : vector<8xf32> to vector<8x1xf32>
    %15 = tpu.reciprocal %14 {approx = true} : vector<8x1xf32> -> vector<8x1xf32>
    %16 = vector.broadcast %15 : vector<8x1xf32> to vector<8x128xf32>
    %17 = arith.mulf %12, %16 : vector<8x128xf32>
    %c0_6 = arith.constant 0 : index
    %c0_7 = arith.constant 0 : index
    %18 = vector.load %arg3[%c0_6, %c0_7] : memref<1x128xf32, #tpu.memory_space<vmem>>, vector<1x128xf32>
    %19 = vector.broadcast %18 : vector<1x128xf32> to vector<8x128xf32>
    %20 = arith.addf %17, %19 : vector<8x128xf32>
    %cst_8 = arith.constant -1.000000e+30 : f32
    %21 = vector.broadcast %cst_8 : f32 to vector<8x128xf32>
    %22 = arith.select %5, %20, %21 : vector<8x128xi1>, vector<8x128xf32>
    %23 = arith.sitofp %3 : vector<8x128xi32> to vector<8x128xf32>
    %24 = tpu.iota {dimensions = array<i32: 1>} : vector<8x128xi32>
    %cst_9 = arith.constant 0.000000e+00 : f32
    %25 = vector.broadcast %cst_9 : f32 to vector<8x128xf32>
    %c0_i32 = arith.constant 0 : i32
    %26 = vector.broadcast %c0_i32 : i32 to vector<8x128xi32>
    %cst_10 = arith.constant 0.000000e+00 : f32
    %27 = vector.broadcast %cst_10 : f32 to vector<8x128xf32>
    %cst_11 = arith.constant dense<0xFF800000> : vector<8xf32>
    %28 = vector.multi_reduction <maximumf>, %22, %cst_11 [1] : vector<8x128xf32> to vector<8xf32>
    %29 = vector.shape_cast %28 : vector<8xf32> to vector<8x1xf32>
    %30 = vector.broadcast %29 : vector<8x1xf32> to vector<8x128xf32>
    %31 = arith.cmpf oeq, %22, %30 : vector<8x128xf32>
    %cst_12 = arith.constant 1.280000e+02 : f32
    %32 = vector.broadcast %cst_12 : f32 to vector<8x128xf32>
    %33 = arith.select %31, %23, %32 : vector<8x128xi1>, vector<8x128xf32>
    %cst_13 = arith.constant dense<0x7F800000> : vector<8xf32>
    %34 = vector.multi_reduction <minimumf>, %33, %cst_13 [1] : vector<8x128xf32> to vector<8xf32>
    %35 = vector.shape_cast %34 : vector<8xf32> to vector<8x1xf32>
    %36 = arith.fptosi %35 : vector<8x1xf32> to vector<8x1xi32>
    %37 = vector.broadcast %36 : vector<8x1xi32> to vector<8x128xi32>
    %38 = arith.cmpi eq, %3, %37 : vector<8x128xi32>
    %cst_14 = arith.constant 0.000000e+00 : f32
    %39 = vector.broadcast %cst_14 : f32 to vector<8x128xf32>
    %40 = arith.select %38, %17, %39 : vector<8x128xi1>, vector<8x128xf32>
    %cst_15 = arith.constant dense<0.000000e+00> : vector<8xf32>
    %41 = vector.multi_reduction <add>, %40, %cst_15 [1] : vector<8x128xf32> to vector<8xf32>
    %42 = vector.shape_cast %41 : vector<8xf32> to vector<8x1xf32>
    %c0_i32_16 = arith.constant 0 : i32
    %43 = vector.broadcast %c0_i32_16 : i32 to vector<8x128xi32>
    %44 = arith.cmpi eq, %24, %43 : vector<8x128xi32>
    %45 = vector.shape_cast %42 : vector<8x1xf32> to vector<8x1xf32>
    %46 = vector.broadcast %45 : vector<8x1xf32> to vector<8x128xf32>
    %47 = arith.select %44, %46, %25 : vector<8x128xi1>, vector<8x128xf32>
    %c0_i32_17 = arith.constant 0 : i32
    %48 = vector.broadcast %c0_i32_17 : i32 to vector<8x128xi32>
    %49 = arith.cmpi eq, %24, %48 : vector<8x128xi32>
    %50 = vector.shape_cast %36 : vector<8x1xi32> to vector<8x1xi32>
    %51 = vector.broadcast %50 : vector<8x1xi32> to vector<8x128xi32>
    %52 = arith.select %49, %51, %26 : vector<8x128xi1>, vector<8x128xi32>
    %53 = arith.extui %38 : vector<8x128xi1> to vector<8x128xi32>
    %54 = arith.sitofp %53 : vector<8x128xi32> to vector<8x128xf32>
    %55 = arith.addf %27, %54 : vector<8x128xf32>
    %cst_18 = arith.constant -1.000000e+30 : f32
    %56 = vector.broadcast %cst_18 : f32 to vector<8x128xf32>
    %57 = arith.select %38, %56, %22 : vector<8x128xi1>, vector<8x128xf32>
    %cst_19 = arith.constant dense<0xFF800000> : vector<8xf32>
    %58 = vector.multi_reduction <maximumf>, %57, %cst_19 [1] : vector<8x128xf32> to vector<8xf32>
    %59 = vector.shape_cast %58 : vector<8xf32> to vector<8x1xf32>
    %60 = vector.broadcast %59 : vector<8x1xf32> to vector<8x128xf32>
    %61 = arith.cmpf oeq, %57, %60 : vector<8x128xf32>
    %cst_20 = arith.constant 1.280000e+02 : f32
    %62 = vector.broadcast %cst_20 : f32 to vector<8x128xf32>
    %63 = arith.select %61, %23, %62 : vector<8x128xi1>, vector<8x128xf32>
    %cst_21 = arith.constant dense<0x7F800000> : vector<8xf32>
    %64 = vector.multi_reduction <minimumf>, %63, %cst_21 [1] : vector<8x128xf32> to vector<8xf32>
    %65 = vector.shape_cast %64 : vector<8xf32> to vector<8x1xf32>
    %66 = arith.fptosi %65 : vector<8x1xf32> to vector<8x1xi32>
    %67 = vector.broadcast %66 : vector<8x1xi32> to vector<8x128xi32>
    %68 = arith.cmpi eq, %3, %67 : vector<8x128xi32>
    %cst_22 = arith.constant 0.000000e+00 : f32
    %69 = vector.broadcast %cst_22 : f32 to vector<8x128xf32>
    %70 = arith.select %68, %17, %69 : vector<8x128xi1>, vector<8x128xf32>
    %cst_23 = arith.constant dense<0.000000e+00> : vector<8xf32>
    %71 = vector.multi_reduction <add>, %70, %cst_23 [1] : vector<8x128xf32> to vector<8xf32>
    %72 = vector.shape_cast %71 : vector<8xf32> to vector<8x1xf32>
    %c1_i32 = arith.constant 1 : i32
    %73 = vector.broadcast %c1_i32 : i32 to vector<8x128xi32>
    %74 = arith.cmpi eq, %24, %73 : vector<8x128xi32>
    %75 = vector.shape_cast %72 : vector<8x1xf32> to vector<8x1xf32>
    %76 = vector.broadcast %75 : vector<8x1xf32> to vector<8x128xf32>
    %77 = arith.select %74, %76, %47 : vector<8x128xi1>, vector<8x128xf32>
    %c1_i32_24 = arith.constant 1 : i32
    %78 = vector.broadcast %c1_i32_24 : i32 to vector<8x128xi32>
    %79 = arith.cmpi eq, %24, %78 : vector<8x128xi32>
    %80 = vector.shape_cast %66 : vector<8x1xi32> to vector<8x1xi32>
    %81 = vector.broadcast %80 : vector<8x1xi32> to vector<8x128xi32>
    %82 = arith.select %79, %81, %52 : vector<8x128xi1>, vector<8x128xi32>
    %83 = arith.extui %68 : vector<8x128xi1> to vector<8x128xi32>
    %84 = arith.sitofp %83 : vector<8x128xi32> to vector<8x128xf32>
    %85 = arith.addf %55, %84 : vector<8x128xf32>
    %86 = arith.truncf %77 : vector<8x128xf32> to vector<8x128xbf16>
    %c0_25 = arith.constant 0 : index
    %c0_26 = arith.constant 0 : index
    %87 = vector.load %arg4[%c0_25, %c0_26] : memref<8x128xbf16, #tpu.memory_space<vmem>>, vector<8x128xbf16>
    tpu.vector_store %arg4[%c0_25, %c0_26], %86 {strides = array<i32>} : memref<8x128xbf16, #tpu.memory_space<vmem>>, vector<8x128xbf16>,
    %c0_27 = arith.constant 0 : index
    %c0_28 = arith.constant 0 : index
    %88 = vector.load %arg5[%c0_27, %c0_28] : memref<8x128xi32, #tpu.memory_space<vmem>>, vector<8x128xi32>
    tpu.vector_store %arg5[%c0_27, %c0_28], %82 {strides = array<i32>} : memref<8x128xi32, #tpu.memory_space<vmem>>, vector<8x128xi32>,
    %cst_29 = arith.constant dense<0.000000e+00> : vector<128xf32>
    %89 = vector.multi_reduction <add>, %85, %cst_29 [0] : vector<8x128xf32> to vector<128xf32>
    %90 = vector.shape_cast %89 : vector<128xf32> to vector<1x128xf32>
    %c0_30 = arith.constant 0 : index
    %c0_31 = arith.constant 0 : index
    %91 = vector.load %arg6[%c0_30, %c0_31] : memref<8x256xf32, #tpu.memory_space<vmem>>, vector<1x128xf32>
    tpu.vector_store %arg6[%c0_30, %c0_31], %90 {strides = array<i32>} : memref<8x256xf32, #tpu.memory_space<vmem>>, vector<1x128xf32>,
    %cst_32 = arith.constant dense<0.000000e+00> : vector<128xf32>
    %92 = vector.multi_reduction <add>, %17, %cst_32 [0] : vector<8x128xf32> to vector<128xf32>
    %93 = vector.shape_cast %92 : vector<128xf32> to vector<1x128xf32>
    %c0_33 = arith.constant 0 : index
    %c128 = arith.constant 128 : index
    %94 = vector.load %arg6[%c0_33, %c128] : memref<8x256xf32, #tpu.memory_space<vmem>>, vector<1x128xf32>
    tpu.vector_store %arg6[%c0_33, %c128], %93 {strides = array<i32>} : memref<8x256xf32, #tpu.memory_space<vmem>>, vector<1x128xf32>,
    return
  }
  func.func @transform_0(%arg0: i32) -> (i32, i32) {
    %c0_i32 = arith.constant 0 : i32
    %c0_i32_0 = arith.constant 0 : i32
    return %arg0, %c0_i32 : i32, i32
  }
  func.func @transform_1(%arg0: i32) -> (i32, i32) {
    %c0_i32 = arith.constant 0 : i32
    %c0_i32_0 = arith.constant 0 : i32
    %c0_i32_1 = arith.constant 0 : i32
    return %c0_i32, %c0_i32_0 : i32, i32
  }
  func.func @transform_2(%arg0: i32) -> (i32, i32) {
    %c0_i32 = arith.constant 0 : i32
    %c0_i32_0 = arith.constant 0 : i32
    %c0_i32_1 = arith.constant 0 : i32
    return %c0_i32, %c0_i32_0 : i32, i32
  }
  func.func @transform_3(%arg0: i32) -> (i32, i32) {
    %c0_i32 = arith.constant 0 : i32
    %c0_i32_0 = arith.constant 0 : i32
    return %arg0, %c0_i32 : i32, i32
  }
  func.func @transform_4(%arg0: i32) -> (i32, i32) {
    %c0_i32 = arith.constant 0 : i32
    %c0_i32_0 = arith.constant 0 : i32
    return %arg0, %c0_i32 : i32, i32
  }
  func.func @transform_5(%arg0: i32) -> (i32, i32) {
    %c0_i32 = arith.constant 0 : i32
    %c0_i32_0 = arith.constant 0 : i32
    return %arg0, %c0_i32 : i32, i32
  }
}

</mosaic_0001>

<bundles_post_ra>
// kernel: tpu_custom_call.1
= control target key start
LH: loop header
LB: loop body
LE: loop exit
PB: predicated region body
PF: predicated region fallthrough
CT: control target
= control target key end

     0   :  { %11 = vsyncpa [#allocation3], 0  ;;  %s536_s0 = inlined_call_operand.hbm [shape: bf16[8,128], index: 0, kind: input, shape index: {}]   ;;  %s537_s1 = inlined_call_operand.hbm [shape: bf16[128,128], index: 1, kind: input, shape index: {}]   ;;  %s538_s2 = inlined_call_operand.vmem [shape: f32[1,128], index: 2, kind: input, shape index: {}]   ;;  %s539_s3 = inlined_call_operand.hbm [shape: bf16[8,128], index: 3, kind: output, shape index: {0}]   ;;  %s540_s4 = inlined_call_operand.hbm [shape: s32[8,128], index: 4, kind: output, shape index: {1}]   ;;  %s541_s5 = inlined_call_operand.hbm [shape: f32[8,256], index: 5, kind: output, shape index: {2}]  }
   0x1   :  { %12 = vsyncpa [#allocation6], 0 }
   0x2   :  { %13 = vsyncpa [#allocation4], 0 }
   0x3   :  { %14 = vsyncpa [#allocation9], 0  ;;  %s442_s18 = smov [#allocation2]   ;;  %s443_s20 = smov [#allocation5]  }
   0x4   :  { %s21_s19 = sshll.u32 %s442_s18, 4  ;;  %s30_s21 = sshll.u32 %s443_s20, 4  ;;  %s22_s19 = int_to_ptr.vmem [resolvable:$true] %s21_s19  ;;  %s31_s21 = int_to_ptr.vmem [resolvable:$true] %s30_s21 }
   0x5   :  { %s342_s22 = scalar_lea.vmem %s22_s19, 64  ;;  %p347_p1 = scmp.lt.s32.totalorder %s22_s19, %s22_s19 }
   0x6   :  { %p343_p0 = scmp.ne.s32.totalorder %s22_s19, %s342_s22  ;;  %p348_p2 = scmp.lt.s32.totalorder %s342_s22, %s342_s22 }
   0x8   :  { %p349_p3 = por %p348_p2, %p347_p1 }
   0xa   :  { %p350_p4 = pnand %p349_p3, %p343_p0 }
   0xc   :  { %353 = shalt.err (!%p350_p4)
}
   0xd   :  { %24 = dma.hbm_to_vmem [thread:$0]  %s536_s0, 64, %s22_s19, [#allocation3]  }
   0xe   :  { %s362_s25 = scalar_lea.vmem %s31_s21, 1024  ;;  %p367_p6 = scmp.lt.s32.totalorder %s31_s21, %s31_s21 }
   0xf   :  { %p363_p5 = scmp.ne.s32.totalorder %s31_s21, %s362_s25  ;;  %p368_p7 = scmp.lt.s32.totalorder %s362_s25, %s362_s25 }
  0x11   :  { %p369_p8 = por %p368_p7, %p367_p6 }
  0x13   :  { %p370_p9 = pnand %p369_p8, %p363_p5 }
  0x15   :  { %373 = shalt.err (!%p370_p9)
}
  0x16   :  { %s444_s26 = smov 64   ;;  %s445_s27 = smov 4  }
  0x17   :  { %36 = dma.hbm_to_vmem [thread:$0]  %s537_s1, 1024, %s31_s21, [#allocation6], %s444_s26, %s444_s26, %s445_s27  }
  0x18   :  { %434 = dma.done.wait [#allocation3], 64  }
  0x19   :  { %435 = vsyncadd [#allocation3], 4294967232 }
  0x1a   :  { %436 = dma.done.wait [#allocation6], 1024  }
  0x1b   :  { %437 = vsyncadd [#allocation6], 4294966272  ;;  %v446_v0 = vmov 0.0   ;;  %vm447_vm0 = vmmov 0   ;;  %v322_v1 = vld [vmem:[#allocation5 + $0x38] sm:$0xff]   ;;  %v323_v2 = vld [vmem:[#allocation5 + $0x30] sm:$0xff]   ;;  %v151_v10 = vlaneseq }
  0x1c   :  { %289 = vmatprep.subr.bf16.mxu0 %v446_v0  ;;  %305 = vmatprep.mubr.msk.bf16.mxu0 %vm447_vm0, %v446_v0  ;;  %v324_v3 = vld [vmem:[#allocation5 + $0x28] sm:$0xff]   ;;  %v325_v4 = vld [vmem:[#allocation5 + $0x20] sm:$0xff]   ;;  %v326_v5 = vld [vmem:[#allocation5 + $0x18] sm:$0xff]  }
  0x1d   :  { %290 = vmatpush3.bf16.msra.mxu0 %v322_v1  ;;  %v327_v6 = vld [vmem:[#allocation5 + $0x10] sm:$0xff]   ;;  %v328_v7 = vld [vmem:[#allocation5 + $0x8] sm:$0xff]   ;;  %v329_v8 = vld [vmem:[#allocation5] sm:$0xff]   ;;  %v496_v11 = vand.u32 127, %v151_v10 }
  0x1e   :  { %291 = vmatprep.subr.bf16.mxu0 %v446_v0  ;;  %v46_v9 = vld [vmem:[#allocation2] sm:$0xf] }
  0x1f   :  { %vm153_vm1 = vcmp.lt.s32.totalorder %v496_v11, 8  ;;  %v277_v23 = vld [vmem:[%s538_s2] ss:$0 sm:$0xff]  ;;  %v173_v33 = vcvt.s32.f32 %v496_v11  ;;  %vm185_vm5 = vcmp.eq.s32.totalorder %v496_v11, 0  ;;  %vm203_vm6 = vcmp.eq.s32.totalorder %v496_v11, 1  ;;  %s448_s2 = smov [#allocation8]  }
  0x20   :  { %s242_s30 = sshll.u32 %s448_s2, 4  ;;  %s243_s30 = int_to_ptr.vmem [resolvable:$true] %s242_s30 }
  0x21   :  { %292 = vmatpush3.bf16.msra.mxu0 %v323_v2  ;;  %s374_s6 = scalar_lea.vmem %s243_s30, 128  ;;  %p379_p11 = scmp.lt.s32.totalorder %s243_s30, %s243_s30 }
  0x22   :  { %293 = vmatprep.subr.bf16.mxu0 %v446_v0  ;;  %p375_p10 = scmp.ne.s32.totalorder %s243_s30, %s374_s6  ;;  %p380_p12 = scmp.lt.s32.totalorder %s374_s6, %s374_s6 }
  0x24   :  { %p381_p13 = por %p380_p12, %p379_p11 }
  0x25   :  { %294 = vmatpush3.bf16.msra.mxu0 %v324_v3 }
  0x26   :  { %295 = vmatprep.subr.bf16.mxu0 %v446_v0  ;;  %p382_p0 = pnand %p381_p13, %p375_p10 }
  0x29   :  { %296 = vmatpush3.bf16.msra.mxu0 %v325_v4 }
  0x2a   :  { %297 = vmatprep.subr.bf16.mxu0 %v446_v0 }
  0x2d   :  { %298 = vmatpush3.bf16.msra.mxu0 %v326_v5 }
  0x2e   :  { %299 = vmatprep.subr.bf16.mxu0 %v446_v0 }
  0x31   :  { %300 = vmatpush3.bf16.msra.mxu0 %v327_v6 }
  0x32   :  { %301 = vmatprep.subr.bf16.mxu0 %v446_v0 }
  0x35   :  { %302 = vmatpush3.bf16.msra.mxu0 %v328_v7 }
  0x36   :  { %303 = vmatprep.subr.bf16.mxu0 %v446_v0 }
  0x39   :  { %304 = vmatpush3.bf16.msra.mxu0 %v329_v8 }
  0x3c   :  { %306 = vmatmul.mubr.bf16.vlgmr.msra.gmra.mxu0 %v46_v9 }
  0xfc   :  { %v145_v12 = vpop.f32.mrf.mxu0 }
  0xfd   :  { %v154_v13 = vsel %vm153_vm1, %v145_v12, -1e+30 }
  0xfe   :  { %155 = vmax.xlane.f32.xlu0 %v154_v13  ;;  %v307_v14 = vpop.f32.mrf.mxu0 }
 0x100   :  { %v148_v15 = vpop.f32.mrf.mxu0 }
 0x102   :  { %v308_v16 = vpop.f32.mrf.mxu0 }
 0x187   :  { %v156_v17 = vpop.xlane.xlu0 %155 }
 0x188   :  { %v157_v18 = vsub.f32 %v154_v13, %v156_v17 }
 0x18a   :  { %v158_v19 = vmul.f32 1.442695, %v157_v18 }
 0x18c   :  { %330 = vpow2.f32 %v158_v19 }
 0x199   :  { %v331_v20 = vpop.eup %330 }
 0x19a   :  { %160 = vadd.xlane.f32.xlu0 %v331_v20 }
 0x223   :  { %v161_v21 = vpop.xlane.xlu0 %160 }
 0x224   :  { %332 = vrcp.f32 %v161_v21 }
 0x231   :  { %v333_v22 = vpop.eup %332 }
 0x232   :  { %v163_v24 = vmul.f32 %v333_v22, %v331_v20 }
 0x234   :  { %v171_v25 = vadd.f32 %v277_v23, %v163_v24  ;;  %v219_v26 = vrot.slane %v163_v24, 4 }
 0x236   :  { %v172_v27 = vsel %vm153_vm1, %v171_v25, -1e+30  ;;  %v220_v28 = vadd.f32 %v219_v26, %v163_v24 }
 0x237   :  { %174 = vmax.xlane.f32.xlu1 %v172_v27 }
 0x238   :  { %v221_v29 = vrot.slane %v220_v28, 2 }
 0x23a   :  { %v222_v30 = vadd.f32 %v221_v29, %v220_v28 }
 0x23c   :  { %v223_v31 = vrot.slane %v222_v30, 1 }
 0x23e   :  { %v224_v32 = vadd.f32 %v223_v31, %v222_v30 }
 0x240   :  { %225 = vst [vmem:[#allocation10 + $0x8] sm:$0x1] %v224_v32 }
 0x2c0   :  { %v175_v34 = vpop.xlane.xlu1 %174 }
 0x2c1   :  { %vm176_vm2 = vcmp.eq.f32.partialorder %v172_v27, %v175_v34 }
 0x2c2   :  { %v177_v35 = vsel %vm176_vm2, %v173_v33, 128.0 }
 0x2c3   :  { %178 = vmin.xlane.f32.xlu1 %v177_v35 }
 0x34c   :  { %v179_v36 = vpop.xlane.xlu1 %178 }
 0x34d   :  { %v309_v37 = vtrunc.f32 %v179_v36 }
 0x34f   :  { %v310_v38 = vcvt.f32.s32 %v309_v37 }
 0x351   :  { %vm181_vm3 = vcmp.eq.s32.totalorder %v496_v11, %v310_v38  ;;  %v187_v46 = vsel %vm185_vm5, %v310_v38, 0 }
 0x352   :  { %v191_v39 = vsel %vm181_vm3, -1e+30, %v172_v27  ;;  %v182_v40 = vsel %vm181_vm3, %v163_v24, 0.0  ;;  %v278_v50 = vsel %vm181_vm3, 1.0, %v446_v0 }
 0x353   :  { %192 = vmax.xlane.f32.xlu0 %v191_v39 }
 0x357   :  { %183 = vadd.xlane.f32.xlu0 %v182_v40 }
 0x3dc   :  { %v193_v41 = vpop.xlane.xlu0 %192 }
 0x3dd   :  { %vm194_vm4 = vcmp.eq.f32.partialorder %v191_v39, %v193_v41 }
 0x3de   :  { %v195_v42 = vsel %vm194_vm4, %v173_v33, 128.0 }
 0x3df   :  { %196 = vmin.xlane.f32.xlu1 %v195_v42 }
 0x468   :  { %v197_v43 = vpop.xlane.xlu1 %196 }
 0x469   :  { %v311_v44 = vtrunc.f32 %v197_v43 }
 0x46b   :  { %v312_v45 = vcvt.f32.s32 %v311_v44 }
 0x46d   :  { %vm199_vm7 = vcmp.eq.s32.totalorder %v496_v11, %v312_v45  ;;  %v205_v47 = vsel %vm203_vm6, %v312_v45, %v187_v46 }
 0x46e   :  { %v200_v48 = vsel %vm199_vm7, %v163_v24, 0.0  ;;  %v279_v49 = vsel %vm199_vm7, 1.0, %v446_v0  ;;  %211 = vst [vmem:[#allocation8] sm:$0xff] %v205_v47 }
 0x46f   :  { %201 = vadd.xlane.f32.xlu1 %v200_v48  ;;  %v208_v51 = vadd.f32 %v279_v49, %v278_v50 }
 0x471   :  { %v212_v52 = vrot.slane %v208_v51, 4 }
 0x473   :  { %v213_v53 = vadd.f32 %v212_v52, %v208_v51 }
 0x475   :  { %v214_v54 = vrot.slane %v213_v53, 2 }
 0x477   :  { %v215_v55 = vadd.f32 %v214_v54, %v213_v53 }
 0x479   :  { %v216_v56 = vrot.slane %v215_v55, 1 }
 0x47b   :  { %v217_v57 = vadd.f32 %v216_v56, %v215_v55 }
 0x47c   :  { %385 = shalt.err (!%p382_p0)
}
 0x47d   :  { %245 = dma.vmem_to_hbm [thread:$0]  %s243_s30, 128, %s540_s4, [#allocation9]   ;;  %218 = vst [vmem:[#allocation10] sm:$0x1] %v217_v57 }
 0x47e   :  { %s449_s9 = smov [#allocation10]  }
 0x47f   :  { %s252_s10 = sshll.u32 %s449_s9, 4  ;;  %s253_s10 = int_to_ptr.vmem [resolvable:$true] %s252_s10 }
 0x480   :  { %s394_s11 = scalar_lea.vmem %s253_s10, 256  ;;  %p399_p2 = scmp.lt.s32.totalorder %s253_s10, %s253_s10 }
 0x481   :  { %p395_p1 = scmp.ne.s32.totalorder %s253_s10, %s394_s11  ;;  %p400_p3 = scmp.lt.s32.totalorder %s394_s11, %s394_s11 }
 0x483   :  { %p401_p4 = por %p400_p3, %p399_p2 }
 0x485   :  { %p402_p5 = pnand %p401_p4, %p395_p1 }
 0x487   :  { %405 = shalt.err (!%p402_p5)
}
 0x488   :  { %255 = dma.vmem_to_hbm [thread:$0]  %s253_s10, 256, %s541_s5, [#allocation9]   ;;  %v184_v58 = vpop.xlane.xlu0 %183 }
 0x489   :  { %s450_s14 = smov [#allocation7]   ;;  %v186_v59 = vsel %vm185_vm5, %v184_v58, 0.0 }
 0x48a   :  { %s232_s15 = sshll.u32 %s450_s14, 4  ;;  %s233_s15 = int_to_ptr.vmem [resolvable:$true] %s232_s15 }
 0x48b   :  { %s414_s4 = scalar_lea.vmem %s233_s15, 64  ;;  %p419_p7 = scmp.lt.s32.totalorder %s233_s15, %s233_s15 }
 0x48c   :  { %p415_p6 = scmp.ne.s32.totalorder %s233_s15, %s414_s4  ;;  %p420_p8 = scmp.lt.s32.totalorder %s414_s4, %s414_s4 }
 0x48e   :  { %p421_p9 = por %p420_p8, %p419_p7 }
 0x490   :  { %p422_p10 = pnand %p421_p9, %p415_p6 }
 0x4f8   :  { %v202_v60 = vpop.xlane.xlu1 %201 }
 0x4f9   :  { %v204_v61 = vsel %vm203_vm6, %v202_v60, %v186_v59 }
 0x4fa   :  { %v209_v62 = vpack.c.bf16 %v204_v61, %v204_v61 }
 0x4fc   :  { %210 = vst [vmem:[#allocation7] sm:$0xf] %v209_v62 }
 0x4fd   :  { %425 = shalt.err (!%p422_p10)
}
 0x4fe   :  { %235 = dma.vmem_to_hbm [thread:$0]  %s233_s15, 64, %s539_s3, [#allocation4]  }
 0x4ff   :  { %438 = dma.done.wait [#allocation4], 64  }
 0x500   :  { %439 = vsyncadd [#allocation4], 4294967232 }
 0x501   :  { %440 = dma.done.wait [#allocation9], 384  }
 0x502   :  { %441 = vsyncadd [#allocation9], 4294966912 }
 0x503   :  { %265 = vsyncpa [#allocation3], 1 }
 0x504   :  { %266 = vsyncpa [#allocation6], 1 }
 0x505   :  { %267 = vsyncpa [#allocation4], 1 }
 0x506   :  { %268 = vsyncpa [#allocation9], 1 }

</bundles_post_ra>
